<compile_context>
chip_gen: v6e
topology: v6e:2x2x1
jax: 0.10.0
libtpu: 0.0.40
codegen_flags: <defaults>
</compile_context>

<pallas_src>
import functools

import jax
import jax.numpy as jnp
from jax import lax
from jax.experimental import pallas as pl
from jax.experimental.pallas import tpu as pltpu


def _control_kernel(zero_idx_ref, x_ref, w_ref, b_ref, ctrl_ref, o_ref, *,
                    normalize, operator, seq_tile):
    # zero_idx_ref : (B,) int32 in SMEM (scalar prefetch) — first masked row per batch
    # x_ref        : (1, TS, H)  activation tile (compute dtype, e.g. bf16)
    # w_ref        : (H, H)      block (Linear) weight (compute dtype), VMEM resident
    # b_ref        : (1, H)      bias, f32
    # ctrl_ref     : (1, H)      control vector, f32
    # o_ref        : (1, TS, H)  output tile (original activation dtype)
    bi = pl.program_id(0)
    si = pl.program_id(1)

    x = x_ref[0]                                   # (TS, H)
    w = w_ref[...]                                 # (H, H)

    # the wrapped block: Linear(H, H); MXU matmul with f32 accumulation
    h = jnp.dot(x, w, preferred_element_type=jnp.float32) + b_ref[...]   # (TS, H) f32

    # norm_pre^2 = sum(h*h) along lanes (defer sqrt into the combined scale)
    sum_pre = jnp.sum(h * h, axis=-1, keepdims=True)                     # (TS, 1)

    # mask from the scalar-prefetched per-batch zero index:
    #   mask[s] = 1.0 if global_row(s) >= zero_idx[bi] else 0.0
    row = si * seq_tile + lax.broadcasted_iota(jnp.int32, (seq_tile, 1), 0)
    mask = (row >= zero_idx_ref[bi]).astype(jnp.float32)                 # (TS, 1)

    ctrl_term = ctrl_ref[...] * mask                                     # (TS, H)
    if operator == "add":          # BlockControlParams default: current + control
        mod = h + ctrl_term
    else:                          # "replace" — BlockControlParams_GAN operator
        mod = jnp.broadcast_to(ctrl_term, h.shape)

    if normalize:
        sum_post = jnp.sum(mod * mod, axis=-1, keepdims=True)
        # mod / ||mod|| * ||h|| as a single scale; rsqrt lands on the EUP slot.
        scale = lax.rsqrt(sum_post) * jnp.sqrt(sum_pre)
        mod = mod * scale

    o_ref[0] = mod.astype(o_ref.dtype)


def _pick_seq_tile(S, max_tile=512, align=16):
    """Largest tile <= max_tile that divides S and is `align`-aligned (else S)."""
    if S <= max_tile:
        return S
    for t in range(max_tile, 0, -1):
        if S % t == 0 and t % align == 0:
            return t
    return S


def _zero_indices(position_ids):
    """(pos == 0).cumsum(1).argmax(1): index of the LAST position_ids==0 per row."""
    zero = (position_ids == 0).astype(jnp.int32)
    return jnp.argmax(jnp.cumsum(zero, axis=1), axis=1).astype(jnp.int32)   # (B,)


def control_module_forward(x, w, b, control, position_ids=None, normalize=False,
                           operator="add", compute_dtype=jnp.bfloat16,
                           seq_tile=None):
    """ControlModule.forward with block := Linear(H, H).

    x: (B, S, H); w: (H, H); b: (H,); control: (H,) / (1, H) / (1, 1, H);
    position_ids: (B, S) int32 or None.
    """
    B, S, H = x.shape
    out_dtype = x.dtype

    # control reshape semantics from ControlModule.forward (1D / 2D -> (1, 1, H))
    control = jnp.asarray(control)
    assert control.size == H, "only a single (H,) control direction is supported"
    ctrl2 = control.reshape(1, H).astype(jnp.float32)        # keep control in f32
    b2 = jnp.asarray(b).reshape(1, H).astype(jnp.float32)

    if position_ids is not None:
        zero_idx = _zero_indices(position_ids)               # (B,) int32
    else:
        zero_idx = jnp.zeros((B,), jnp.int32)                # mask == 1 everywhere

    TS = seq_tile if seq_tile is not None else _pick_seq_tile(S)
    assert S % TS == 0, "sequence length must be divisible by the sequence tile"
    grid = (B, S // TS)

    x_c = x.astype(compute_dtype)
    w_c = jnp.asarray(w).astype(compute_dtype)

    # VMEM budget: resident W + double-buffered in/out tiles + small operands.
    c_bytes = jnp.dtype(compute_dtype).itemsize
    o_bytes = jnp.dtype(out_dtype).itemsize
    vmem_needed = (H * H * c_bytes                      # resident weight
                   + 2 * TS * H * (c_bytes + o_bytes)   # double-buffered x / out
                   + 4 * H * 4 + (1 << 20))             # bias/ctrl + slack
    vmem_limit = int(min(128 * 1024 * 1024, max(32 * 1024 * 1024, 2 * vmem_needed)))

    kernel = functools.partial(_control_kernel, normalize=normalize,
                               operator=operator, seq_tile=TS)

    cost = pl.CostEstimate(
        flops=2 * B * S * H * H,
        transcendentals=(2 * B * S) if normalize else 0,
        bytes_accessed=x_c.size * c_bytes + w_c.size * c_bytes
        + B * S * H * o_bytes + 2 * H * 4,
    )

    return pl.pallas_call(
        kernel,
        out_shape=jax.ShapeDtypeStruct((B, S, H), out_dtype),
        grid_spec=pltpu.PrefetchScalarGridSpec(
            num_scalar_prefetch=1,
            grid=grid,
            in_specs=[
                pl.BlockSpec((1, TS, H), lambda bi, si, zi: (bi, si, 0)),   # x tile
                pl.BlockSpec((H, H), lambda bi, si, zi: (0, 0)),            # W (resident)
                pl.BlockSpec((1, H), lambda bi, si, zi: (0, 0)),            # bias
                pl.BlockSpec((1, H), lambda bi, si, zi: (0, 0)),            # control
            ],
            out_specs=pl.BlockSpec((1, TS, H), lambda bi, si, zi: (bi, si, 0)),
        ),
        compiler_params=pltpu.CompilerParams(
            dimension_semantics=("parallel", "parallel"),
            vmem_limit_bytes=vmem_limit),
        cost_estimate=cost,
    )(zero_idx, x_c, w_c, b2, ctrl2)


def _reference(x, w, b, control, position_ids, normalize, operator, compute_dtype):
    """Pure-JAX reference with the same bf16 matmul operands as the kernel."""
    B, S, H = x.shape
    h = jnp.einsum("bsh,hk->bsk", x.astype(compute_dtype), w.astype(compute_dtype),
                   preferred_element_type=jnp.float32)
    h = h + b.reshape(1, 1, H).astype(jnp.float32)
    norm_pre = jnp.linalg.norm(h, axis=-1, keepdims=True)
    ctrl = control.reshape(1, 1, -1).astype(jnp.float32)
    if position_ids is not None:
        zi = _zero_indices(position_ids).reshape(B, 1)
        col = jnp.arange(S, dtype=jnp.int32)[None, :]
        mask = (col >= zi).astype(jnp.float32).reshape(B, S, 1)
    else:
        mask = jnp.ones((B, S, 1), jnp.float32)
    ctrl_term = ctrl * mask
    mod = h + ctrl_term if operator == "add" else jnp.broadcast_to(ctrl_term, h.shape)
    if normalize:
        norm_post = jnp.linalg.norm(mod, axis=-1, keepdims=True)
        mod = mod / norm_post * norm_pre
    return mod.astype(x.dtype)


if __name__ == "__main__":
    B, S, H = 2, 8, 32
    key = jax.random.PRNGKey(0)
    kx, kw, kb, kc = jax.random.split(key, 4)

    x = jax.random.normal(kx, (B, S, H), dtype=jnp.float32)
    w = jax.random.normal(kw, (H, H), dtype=jnp.float32) * 0.1
    b = jax.random.normal(kb, (H,), dtype=jnp.float32) * 0.1
    control = jax.random.normal(kc, (H,), dtype=jnp.float32)

    # position_ids with a restart mid-sequence so the mask is non-trivial
    position_ids = jnp.array(
        [[0, 1, 2, 3, 4, 5, 6, 7],
         [0, 1, 2, 0, 1, 2, 3, 4]], dtype=jnp.int32)

    out = control_module_forward(
        x, w, b, control, position_ids=position_ids, normalize=True)
    out = jax.block_until_ready(out)

    ref = _reference(x, w, b, control, position_ids,
                     normalize=True, operator="add",
                     compute_dtype=jnp.bfloat16)
    assert jnp.allclose(out, ref, atol=2e-3, rtol=2e-3), "mismatch vs reference"

    # also exercise the no-position_ids path (mask == 1.0), no normalize
    out2 = jax.block_until_ready(
        control_module_forward(x, w, b, control, position_ids=None, normalize=False))
    ref2 = _reference(x, w, b, control, None, normalize=False, operator="add",
                      compute_dtype=jnp.bfloat16)
    assert jnp.allclose(out2, ref2, atol=2e-3, rtol=2e-3), "mismatch (no pos_ids)"

    print("KERNEL_OK")
</pallas_src>

<mosaic_0001>
module attributes {stable_mosaic.version = 11 : i64} {
  func.func @_control_kernel(%arg0: i32, %arg1: i32, %arg2: memref<2xi32, #tpu.memory_space<smem>>, %arg3: memref<1x8x32xbf16, #tpu.memory_space<vmem>>, %arg4: memref<32x32xbf16, #tpu.memory_space<vmem>>, %arg5: memref<1x32xf32, #tpu.memory_space<vmem>>, %arg6: memref<1x32xf32, #tpu.memory_space<vmem>>, %arg7: memref<1x8x32xf32, #tpu.memory_space<vmem>>) attributes {dimension_semantics = [#tpu.dimension_semantics<parallel>, #tpu.dimension_semantics<parallel>], iteration_bounds = array<i64: 2, 1>, scalar_prefetch = 1 : i64, scratch_operands = 0 : i64, tpu.core_type = #tpu.core_type<tc>, window_params = [{transform_indices = @transform_0, window_bounds = array<i64: 1, 8, 32>}, {pipeline_mode = #tpu.pipeline_mode<synchronous>, transform_indices = @transform_1, window_bounds = array<i64: 32, 32>}, {pipeline_mode = #tpu.pipeline_mode<synchronous>, transform_indices = @transform_2, window_bounds = array<i64: 1, 32>}, {pipeline_mode = #tpu.pipeline_mode<synchronous>, transform_indices = @transform_3, window_bounds = array<i64: 1, 32>}, {transform_indices = @transform_4, window_bounds = array<i64: 1, 8, 32>}]} {
    %c0 = arith.constant 0 : index
    %c0_0 = arith.constant 0 : index
    %c0_1 = arith.constant 0 : index
    %0 = vector.load %arg3[%c0, %c0_0, %c0_1] : memref<1x8x32xbf16, #tpu.memory_space<vmem>>, vector<1x8x32xbf16>
    %1 = vector.shape_cast %0 : vector<1x8x32xbf16> to vector<8x32xbf16>
    %c0_2 = arith.constant 0 : index
    %c0_3 = arith.constant 0 : index
    %2 = vector.load %arg4[%c0_2, %c0_3] : memref<32x32xbf16, #tpu.memory_space<vmem>>, vector<32x32xbf16>
    %cst = arith.constant dense<0.000000e+00> : vector<8x32xf32>
    %3 = tpu.matmul %1, %2, %cst {dimension_numbers = #tpu.dot_dimension_numbers<[1], [0], [0], [1], [0, 0, 1, 1], [], []>} : vector<8x32xbf16>, vector<32x32xbf16>, vector<8x32xf32> -> vector<8x32xf32>
    %c0_4 = arith.constant 0 : index
    %c0_5 = arith.constant 0 : index
    %4 = vector.load %arg5[%c0_4, %c0_5] : memref<1x32xf32, #tpu.memory_space<vmem>>, vector<1x32xf32>
    %5 = vector.broadcast %4 : vector<1x32xf32> to vector<8x32xf32>
    %6 = arith.addf %3, %5 : vector<8x32xf32>
    %7 = arith.mulf %6, %6 : vector<8x32xf32>
    %cst_6 = arith.constant dense<0.000000e+00> : vector<8xf32>
    %8 = vector.multi_reduction <add>, %7, %cst_6 [1] : vector<8x32xf32> to vector<8xf32>
    %9 = vector.shape_cast %8 : vector<8xf32> to vector<8x1xf32>
    %c8_i32 = arith.constant 8 : i32
    %10 = arith.muli %arg1, %c8_i32 : i32
    %11 = tpu.iota {dimensions = array<i32: 0>} : vector<8x1xi32>
    %12 = vector.broadcast %10 : i32 to vector<8x1xi32>
    %13 = arith.addi %12, %11 : vector<8x1xi32>
    %14 = arith.index_cast %arg0 : i32 to index
    %15 = memref.load %arg2[%14] : memref<2xi32, #tpu.memory_space<smem>>
    %16 = vector.broadcast %15 : i32 to vector<8x1xi32>
    %17 = arith.cmpi sge, %13, %16 : vector<8x1xi32>
    %18 = arith.extui %17 : vector<8x1xi1> to vector<8x1xi32>
    %19 = arith.sitofp %18 : vector<8x1xi32> to vector<8x1xf32>
    %c0_7 = arith.constant 0 : index
    %c0_8 = arith.constant 0 : index
    %20 = vector.load %arg6[%c0_7, %c0_8] : memref<1x32xf32, #tpu.memory_space<vmem>>, vector<1x32xf32>
    %21 = vector.broadcast %20 : vector<1x32xf32> to vector<8x32xf32>
    %22 = vector.broadcast %19 : vector<8x1xf32> to vector<8x32xf32>
    %23 = arith.mulf %21, %22 : vector<8x32xf32>
    %24 = arith.addf %6, %23 : vector<8x32xf32>
    %25 = arith.mulf %24, %24 : vector<8x32xf32>
    %cst_9 = arith.constant dense<0.000000e+00> : vector<8xf32>
    %26 = vector.multi_reduction <add>, %25, %cst_9 [1] : vector<8x32xf32> to vector<8xf32>
    %27 = vector.shape_cast %26 : vector<8xf32> to vector<8x1xf32>
    %28 = math.rsqrt %27 : vector<8x1xf32>
    %29 = math.sqrt %9 : vector<8x1xf32>
    %30 = arith.mulf %28, %29 : vector<8x1xf32>
    %31 = vector.broadcast %30 : vector<8x1xf32> to vector<8x32xf32>
    %32 = arith.mulf %24, %31 : vector<8x32xf32>
    %c0_10 = arith.constant 0 : index
    %c0_11 = arith.constant 0 : index
    %c0_12 = arith.constant 0 : index
    %33 = vector.load %arg7[%c0_10, %c0_11, %c0_12] : memref<1x8x32xf32, #tpu.memory_space<vmem>>, vector<1x8x32xf32>
    %34 = vector.shape_cast %33 : vector<1x8x32xf32> to vector<8x32xf32>
    %35 = vector.shape_cast %32 : vector<8x32xf32> to vector<1x8x32xf32>
    tpu.vector_store %arg7[%c0_10, %c0_11, %c0_12], %35 {strides = array<i32>} : memref<1x8x32xf32, #tpu.memory_space<vmem>>, vector<1x8x32xf32>,
    return
  }
  func.func @transform_0(%arg0: i32, %arg1: i32, %arg2: memref<2xi32, #tpu.memory_space<smem>>) -> (i32, i32, i32) {
    %c0_i32 = arith.constant 0 : i32
    %c0_i32_0 = arith.constant 0 : i32
    return %arg0, %arg1, %c0_i32 : i32, i32, i32
  }
  func.func @transform_1(%arg0: i32, %arg1: i32, %arg2: memref<2xi32, #tpu.memory_space<smem>>) -> (i32, i32) {
    %c0_i32 = arith.constant 0 : i32
    %c0_i32_0 = arith.constant 0 : i32
    %c0_i32_1 = arith.constant 0 : i32
    return %c0_i32, %c0_i32_0 : i32, i32
  }
  func.func @transform_2(%arg0: i32, %arg1: i32, %arg2: memref<2xi32, #tpu.memory_space<smem>>) -> (i32, i32) {
    %c0_i32 = arith.constant 0 : i32
    %c0_i32_0 = arith.constant 0 : i32
    %c0_i32_1 = arith.constant 0 : i32
    return %c0_i32, %c0_i32_0 : i32, i32
  }
  func.func @transform_3(%arg0: i32, %arg1: i32, %arg2: memref<2xi32, #tpu.memory_space<smem>>) -> (i32, i32) {
    %c0_i32 = arith.constant 0 : i32
    %c0_i32_0 = arith.constant 0 : i32
    %c0_i32_1 = arith.constant 0 : i32
    return %c0_i32, %c0_i32_0 : i32, i32
  }
  func.func @transform_4(%arg0: i32, %arg1: i32, %arg2: memref<2xi32, #tpu.memory_space<smem>>) -> (i32, i32, i32) {
    %c0_i32 = arith.constant 0 : i32
    %c0_i32_0 = arith.constant 0 : i32
    return %arg0, %arg1, %c0_i32 : i32, i32, i32
  }
}

</mosaic_0001>

<bundles_post_ra>
// kernel: tpu_custom_call.1
= control target key start
LH: loop header
LB: loop body
LE: loop exit
PB: predicated region body
PF: predicated region fallthrough
CT: control target
= control target key end

     0   :  { %s728_s18 = smov [#allocation3]   ;;  %s948_s0 = inlined_call_operand.hbm [shape: s32[2], index: 0, kind: input, shape index: {}]   ;;  %s949_s1 = inlined_call_operand.hbm [shape: bf16[2,8,32], index: 1, kind: input, shape index: {}]   ;;  %s950_s2 = inlined_call_operand.hbm [shape: bf16[32,32], index: 2, kind: input, shape index: {}]   ;;  %s951_s3 = inlined_call_operand.vmem [shape: f32[1,32], index: 3, kind: input, shape index: {}]   ;;  %s952_s4 = inlined_call_operand.vmem [shape: f32[1,32], index: 4, kind: input, shape index: {}]   ;;  %s953_s5 = inlined_call_operand.hbm [shape: f32[2,8,32], index: 5, kind: output, shape index: {}]  }
   0x1   :  { %955 = sst [smem:[#allocation14_spill]] %s950_s2 }
   0x2   :  { %11 = dma.hbm_to_smem %s948_s0, 16, %s728_s18, [#allocation2] }
   0x3   :  { %690 = dma.done.wait [#allocation2], 16 }
   0x4   :  { %691 = vsyncadd [#allocation2], 4294967280 }
   0x5   :  { %13 = sfence }
   0x6   :  { %14 = vsyncpa [#allocation5], 0 }
   0x7   :  { %16 = vsyncpa [#allocation5 + $0x1], 0 }
   0x8   :  { %17 = vsyncpa [#allocation8], 0 }
   0x9   :  { %18 = vsyncpa [#allocation6], 0 }
   0xa   :  { %20 = vsyncpa [#allocation6 + $0x1], 0  ;;  %s769_s21 = smov 0   ;;  %s771_s22 = smov 0  }
   0xb   :  { %s773_s23 = smov 0   ;;  %s775_s24 = smov 0  }
   0xc   :  { %s777_s25 = smov 0   ;;  %s779_s26 = smov 0  }
   0xd LB: > { %s462_s0 = sadd.s32 4294967295, %s726_s26   ;;  %s463_s27 = sadd.s32 4294967294, %s726_s26   ;;  %s726_s26 = sphi %s779_s26, %s26_s26   ;;  %s722_s25 = sphi %s777_s25, %s973_s25   ;;  %s718_s24 = sphi %s775_s24, %s972_s24   ;;  %s714_s23 = sphi %s773_s23, %s971_s23   ;;  %s710_s22 = sphi %s771_s22, %s970_s22   ;;  %s706_s21 = sphi %s769_s21, %s969_s21  }
   0xe   : > { %p60_p0 = scmp.ne.s32.totalorder %s710_s22, %s706_s21  ;;  %p803_p1 = scmp.eq.s32.totalorder %s462_s0, 0 }
   0xf   : > { %p807_p2 = scmp.eq.s32.totalorder %s462_s0, 1  ;;  %p155_p3 = scmp.eq.s32.totalorder %s463_s27, 1 }
  0x10   : > { %p813_p4 = por %p803_p1, %p60_p0  ;;  %p464_p5 = scmp.ge.s32.totalorder %s726_s26, 1 }
  0x11   : > { %p818_p6 = por %p155_p3, %p60_p0  ;;  %p162_p7 = scmp.lt.s32.totalorder %s726_s26, 3 }
  0x12   : > { %s958_s30 = scalar_select %p813_p4, 1, 0 }
  0x13   : > { %s959_s6 = scalar_select %p818_p6, 1, 0 }
  0x14   : > { %p823_p8 = pnand %p464_p5, %p162_p7  ;;  %s729_s8 = smov [#allocation7]  }
  0x15   : > { %s174_s9 = sshll.u32 %s729_s8, 4  ;;  %s38_s11 = sadd.s32 1, %s722_s25  ;;  %s175_s9 = int_to_ptr.vmem [resolvable:$true] %s174_s9 }
  0x16   : > { %p502_p9 = pneg %p823_p8  ;;  %s597_s12 = scalar_lea.vmem %s175_s9, 256 }
  0x17   : > { %p598_p13 = scmp.ne.s32.totalorder %s175_s9, %s597_s12  ;;  %p605_p5 = scmp.lt.s32.totalorder %s175_s9, %s175_s9 }
  0x18   : > { %p832_p11 = pnand %p502_p9, %p803_p1  ;;  %p606_p7 = scmp.lt.s32.totalorder %s597_s12, %s597_s12 }
  0x1a   : > { %p588_p12 = pneg %p832_p11  ;;  %p607_p6 = por %p606_p7, %p605_p5 }
  0x1c   : > { %p600_p0 = pnand %p598_p13, %p588_p12 }
  0x1e   : > { %p601_p3 = pneg %p600_p0 }
  0x20   : > { %p608_p4 = pnand %p607_p6, %p601_p3 }
  0x22   : > { %611 = shalt.err (!%p608_p4)
}
  0x23   : > { %s730_s13 = smov 64   ;;  %s731_s14 = smov 4  }
  0x24   : > { %s962_s2 = sld [smem:[#allocation14_spill]]  ;;  %p40_p6 = scmp.ge.s32.totalorder %s38_s11, 2 }
  0x25   : > { %s47_s17 = sadd.s32 1, %s714_s23  ;;  %p54_p4 = scmp.ne.s32.totalorder %s714_s23, %s710_s22 }
  0x26   : > { %p55_p9 = scmp.eq.s32.totalorder %s726_s26, 0  ;;  %s975_s11 = smov (%p40_p6, %s38_s11), 0 }
  0x27   : > { %p856_p13 = por %p807_p2, %p54_p4  ;;  %s42_s20 = ssub.s32 %s722_s25, %s975_s11 }
  0x28   : > { %p850_p12 = por %p55_p9, %p54_p4  ;;  %p515_p0 = scmp.lt.s32.totalorder %s726_s26, 2 }
  0x29   : > { %s194_s0 = sand.u32 1, %s714_s23  }
  0x2a   : > { %505 = dma.hbm_to_vmem [thread:$0]  (!%p832_p11), %s962_s2, 256, %s175_s9, [#allocation8], %s730_s13, %s730_s13, %s731_s14  }
  0x2b   : > { %p45_p11 = scmp.eq.s32.totalorder %s42_s20, 0  ;;  %s467_s27 = sshll.u32 %s194_s0, 2 }
  0x2c   : > { %s468_s9 = sshll.u32 %s722_s25, 6  ;;  %s198_s14 = scalar_lea.vmem [#allocation4], %s467_s27 }
  0x2d   : > { %s865_s8 = scalar_select %p45_p11, %s714_s23, %s47_s17  }
  0x2e   : > { %s204_s13 = scalar_lea.hbm %s949_s1, %s468_s9  ;;  %s206_s15 = sshll.u32 %s198_s14, 4  ;;  %s207_s15 = int_to_ptr.vmem [resolvable:$true] %s206_s15 }
  0x2f   : > { %p873_p2 = pnand %p515_p0, %p850_p12  ;;  %s195_s16 = scalar_lea.sflag [#allocation5], %s194_s0 }
  0x30   : > { %s625_s20 = scalar_lea.vmem %s207_s15, 64  ;;  %s732_s17 = smov [#allocation4]  }
  0x31   : > { %p614_p3 = pneg %p873_p2  ;;  %p626_p5 = scmp.ne.s32.totalorder %s207_s15, %s625_s20 }
  0x32   : > { %s630_s2 = sshll.u32 %s732_s17, 4  ;;  %s631_s2 = int_to_ptr.vmem [resolvable:$false] %s630_s2 }
  0x33   : > { %p628_p7 = pnand %p626_p5, %p614_p3  ;;  %s632_s9 = scalar_lea.vmem %s631_s2, 128 }
  0x34   : > { %p633_p4 = scmp.lt.s32.totalorder %s207_s15, %s631_s2  ;;  %p634_p9 = scmp.lt.s32.totalorder %s632_s9, %s625_s20 }
  0x35   : > { %p629_p6 = pneg %p628_p7 }
  0x36   : > { %p635_p11 = por %p634_p9, %p633_p4 }
  0x38   : > { %p636_p10 = pnand %p635_p11, %p629_p6 }
  0x3a   : > { %639 = shalt.err (!%p636_p10)
}
  0x3b   : > { %509 = dma.hbm_to_vmem [thread:$0]  (!%p873_p2), %s204_s13, 64, %s207_s15, %s195_s16  }
  0x3c   : > { %215 = sbr.rel (%p823_p8) target bundleno = 448 (0x1c0), region = 36  ;;  %s884_s18 = sand.u32 (!%p823_p8), 1, %s710_s22  }
  0x3d   : > { %s470_s0 = sshll.u32 (!%p823_p8), %s884_s18, 2  ;;  %s218_s27 = scalar_lea.sflag (!%p823_p8), [#allocation5], %s884_s18 }
  0x3e   : > { %s221_s10 = scalar_lea.vmem (!%p823_p8), [#allocation4], %s470_s0  ;;  %p966_p12 = scmp.ne.s32.totalorder (!%p823_p8), %s958_s30, 0 }
  0x41   : > { %693 = dma.done.wait (%p966_p12), %s218_s27, 64  }
  0x42   : > { %695 = vsyncadd (%p966_p12), %s218_s27, 4294967232 }
  0x43   : > { %697 = dma.done.wait (%p803_p1), [#allocation8], 256  }
  0x44   : > { %699 = vsyncadd (%p803_p1), [#allocation8], 4294967040  ;;  %v733_v0 = vmov 0.0   ;;  %vm734_vm0 = vmmov 0   ;;  %v572_v1 = vld [vmem:[#allocation7 + $0x8] sm:$0xff]   ;;  %v573_v2 = vld [vmem:[#allocation7] sm:$0xff]   ;;  %v324_v4 = vlaneseq }
  0x45   : > { %486 = vmatprep.subr.bf16.mxu0 %v733_v0  ;;  %490 = vmatprep.mubr.msk.bf16.mxu0 %vm734_vm0, %v733_v0  ;;  %v251_v3 = vld [vmem:[%s221_s10] sm:$0xf]  ;;  %vm275_vm1 = vcmask 261120   ;;  %s328_s2 = sld [smem:[#allocation3 + %s718_s24]]  ;;  %s472_s13 = sshll.u32 %s884_s18, 3 }
  0x46   : > { %487 = vmatpush3.bf16.msra.mxu0 %v572_v1  ;;  %v325_v5 = vshrl.u32 %v324_v4, 7  ;;  %v478_v8 = vld [vmem:[%s952_s4] ss:$0 sm:$0xff]  ;;  %s480_s14 = sshll.u32 %s718_s24, 7  ;;  %s249_s15 = scalar_lea.vmem [#allocation9], %s472_s13 }
  0x47   : > { %488 = vmatprep.subr.bf16.mxu0 %v733_v0  ;;  %v473_v9 = vld [vmem:[%s951_s3] ss:$0 sm:$0xff]  ;;  %s372_s29 = sshll.u32 %s249_s15, 4  ;;  %s370_s17 = scalar_lea.hbm %s953_s5, %s480_s14  ;;  %s373_s29 = int_to_ptr.vmem [resolvable:$true] %s372_s29 }
  0x48   : > { %s358_s9 = scalar_lea.sflag [#allocation6], %s884_s18  ;;  %s640_s0 = scalar_lea.vmem %s373_s29, 128 }
  0x49   : > { %p641_p1 = scmp.ne.s32.totalorder %s373_s29, %s640_s0  ;;  %s735_s27 = smov [#allocation9]  }
  0x4a   : > { %489 = vmatpush3.bf16.msra.mxu0 %v573_v2  ;;  %s644_s10 = sshll.u32 %s735_s27, 4  ;;  %s645_s10 = int_to_ptr.vmem [resolvable:$false] %s644_s10 }
  0x4b   : > { %v329_v6 = vstv %s328_s2  ;;  %p642_p8 = pnand %p641_p1, %p856_p13  ;;  %s646_s24 = scalar_lea.vmem %s645_s10, 256 }
  0x4c   : > { %vm330_vm2 = vcmp.ge.s32.totalorder %v325_v5, %v329_v6  ;;  %p647_p0 = scmp.lt.s32.totalorder %s373_s29, %s645_s10  ;;  %p648_p2 = scmp.lt.s32.totalorder %s646_s24, %s640_s0 }
  0x4d   : > { %491 = vmatmul.mubr.msk.bf16.vlgmr.msra.gmra.mxu0 %vm275_vm1, %v251_v3  ;;  %v477_v7 = vsel %vm330_vm2, 1.0, %v733_v0  ;;  %p643_p10 = pneg %p642_p8 }
  0x4e   : > { %v340_v10 = vmul.f32 %v478_v8, %v477_v7  ;;  %p649_p3 = por %p648_p2, %p647_p0 }
  0x50   : > { %p650_p5 = pnand %p649_p3, %p643_p10 }
 0x10d   : > { %v313_v11 = vpop.f32.mrf.mxu0 }
 0x10e   : > { %v314_v12 = vadd.f32 %v473_v9, %v313_v11 }
 0x10f   : > { %v492_v13 = vpop.f32.mrf.mxu0 }
 0x110   : > { %v341_v14 = vadd.f32 %v340_v10, %v314_v12  ;;  %v319_v15 = vmul.f32 %v314_v12, %v314_v12 }
 0x111   : > { %v316_v16 = vpop.f32.mrf.mxu0 }
 0x112   : > { %v320_v17 = vsel %vm275_vm1, %v319_v15, 0.0  ;;  %v342_v18 = vmul.f32 %v341_v14, %v341_v14 }
 0x113   : > { %321 = vadd.xlane.f32.xlu0 %v320_v17  ;;  %v493_v19 = vpop.f32.mrf.mxu0 }
 0x114   : > { %v343_v20 = vsel %vm275_vm1, %v342_v18, 0.0 }
 0x117   : > { %344 = vadd.xlane.f32.xlu0 %v343_v20 }
 0x19c   : > { %v322_v21 = vpop.xlane.xlu0 %321 }
 0x19d   : > { %574 = vrsqrt.f32 %v322_v21  ;;  %vm349_vm3 = vcmp.eq.f32.partialorder %v322_v21, inf  ;;  %v352_v25 = vand.u32 2147483648, %v322_v21  ;;  %vm351_vm4 = vcmp.eq.f32.partialorder %v322_v21, 0.0 }
 0x1a0   : > { %v345_v22 = vpop.xlane.xlu0 %344 }
 0x1a1   : > { %576 = vrsqrt.f32 %v345_v22 }
 0x1aa   : > { %v575_v23 = vpop.eup %574 }
 0x1ab   : > { %v348_v24 = vmul.f32 %v575_v23, %v322_v21 }
 0x1ad   : > { %v350_v26 = vsel %vm349_vm3, %v322_v21, %v348_v24 }
 0x1ae   : > { %v577_v27 = vpop.eup %576  ;;  %v353_v28 = vsel %vm351_vm4, %v352_v25, %v350_v26 }
 0x1af   : > { %v354_v29 = vmul.f32 %v577_v27, %v353_v28 }
 0x1b1   : > { %v355_v30 = vmul.f32 %v354_v29, %v341_v14 }
 0x1b3   : > { %356 = vst.msk [vmem:[%s249_s15] sm:$0xff] %vm275_vm1, %v355_v30 }
 0x1b4   : > { %653 = shalt.err (!%p650_p5)
}
 0x1b5   : > { %s654_s2 = scalar_lea.hbm %s370_s17, 128  ;;  %s658_s30 = scalar_lea.hbm %s953_s5, 256 }
 0x1b6   : > { %p655_p7 = scmp.ne.s32.totalorder %s370_s17, %s654_s2  ;;  %p659_p9 = scmp.lt.s32.totalorder %s370_s17, %s953_s5 }
 0x1b7   : > { %p660_p11 = scmp.lt.s32.totalorder %s658_s30, %s654_s2 }
 0x1b8   : > { %p656_p6 = pnand %p655_p7, %p856_p13 }
 0x1b9   : > { %p661_p12 = por %p660_p11, %p659_p9 }
 0x1ba   : > { %p657_p4 = pneg %p656_p6 }
 0x1bc   : > { %p662_p1 = pnand %p661_p12, %p657_p4 }
 0x1be   : > { %665 = shalt.err (!%p662_p1)
}
 0x1bf   : > { %500 = dma.vmem_to_hbm [thread:$0]  (%p856_p13), %s373_s29, 128, %s370_s17, %s358_s9  }
 0x1c0 PF: > { %s384_s13 = sand.u32 1, %s706_s21   ;;  %p967_p8 = scmp.ne.s32.totalorder %s959_s6, 0 }
 0x1c1   : > { %p968_p10 = scmp.ge.s32.totalorder %s726_s26, 2  ;;  %s385_s14 = scalar_lea.sflag [#allocation6], %s384_s13 }
 0x1c3   : > { %p511_p0 = pnand %p968_p10, %p967_p8 }
 0x1c5   : > { %p512_p2 = pneg %p511_p0 }
 0x1c7   : > { %701 = dma.done.wait (%p512_p2), %s385_s14, 128  }
 0x1c8   : > { %703 = vsyncadd (%p512_p2), %s385_s14, 4294967168  ;;  %s26_s26 = sadd.s32 1, %s726_s26   ;;  %s969_s21 = smov %s710_s22 }
 0x1c9   : > { %p23_p3 = scmp.ge.s32.totalorder %s26_s26, 4   ;;  %s970_s22 = smov %s714_s23 }
 0x1ca   : > { %s971_s23 = smov %s865_s8  ;;  %s972_s24 = smov %s722_s25 }
 0x1cb   : > { %s973_s25 = smov %s975_s11  ;;  %25 = sbr.rel (!%p23_p3) target bundleno = 13 (0xd), region = 85 }
 0x1d0   :  { %390 = vsyncpa [#allocation5], 1 }
 0x1d1   :  { %392 = vsyncpa [#allocation5 + $0x1], 1 }
 0x1d2   :  { %393 = vsyncpa [#allocation8], 1 }
 0x1d3   :  { %394 = vsyncpa [#allocation6], 1 }
 0x1d4   :  { %396 = vsyncpa [#allocation6 + $0x1], 1 }

</bundles_post_ra>
